<compile_context>
chip_gen: v7x
topology: tpu7x:2x2x1
jax: 0.10.0
libtpu: 0.0.40
codegen_flags: <defaults>
</compile_context>

<pallas_src>
import functools

import jax
import jax.numpy as jnp
from jax import lax
from jax.experimental import pallas as pl
from jax.experimental.pallas import tpu as pltpu


def _round_up(x, m):
    return ((x + m - 1) // m) * m


def _rhn_kernel(wx_ref, r_ref, b_ref, preds_ref, hw_ref, s_ref, *,
                rec_depth, t_block, n_units_p):
    """One grid step = one (batch_block, t_block) tile of the recurrence."""
    # Reset hidden state at the start of every batch block (time is the inner,
    # sequential grid axis; it must stay "arbitrary").
    @pl.when(pl.program_id(1) == 0)
    def _():
        s_ref[...] = jnp.zeros_like(s_ref)

    def step(i, s):
        wx_t = wx_ref[i]  # (Bb, 2*Np): precomputed [x@W_H | x@W_T] at step i
        for l in range(rec_depth):  # static unroll of the recurrence depth
            # Fused H/T gate matmul: (Bb, Np) x (Np, 2*Np) -> (Bb, 2*Np)
            pre = jnp.dot(s, r_ref[l], preferred_element_type=jnp.float32)
            pre = pre + b_ref[l]
            if l == 0:
                pre = pre + wx_t
            h_l = jnp.tanh(pre[:, :n_units_p])
            t_l = jax.nn.sigmoid(pre[:, n_units_p:])
            # couple_gates=True  =>  s = h*t + (1-t)*s
            s = h_l * t_l + (1.0 - t_l) * s
            hw_ref[i, l] = s
        preds_ref[i] = s
        return s

    s_final = lax.fori_loop(0, t_block, step, s_ref[...])
    s_ref[...] = s_final


def rhn_forward(x, params, *, n_units, rec_depth, t_block=32, batch_block=None):
    """x: (batch, seq, in_feats) float32. Returns (out, highway_states)."""
    batch, seq, in_feats = x.shape
    n_p = _round_up(n_units, 128)        # lane-dense hidden width
    b_p = _round_up(batch, 8)            # sublane-aligned batch

    if batch_block is None:
        batch_block = b_p
    batch_block = _round_up(batch_block, 8)
    b_p = _round_up(b_p, batch_block)

    t_block = max(1, min(t_block, seq))
    seq_p = _round_up(seq, t_block)

    f32 = jnp.float32
    pad_to = lambda a, s: jnp.pad(a.astype(f32),
                                  [(0, d - e) for e, d in zip(a.shape, s)])

    # ---- fused, padded parameters ------------------------------------------
    w_h = pad_to(params["W_H"], (in_feats, n_p))
    w_t = pad_to(params["W_T"], (in_feats, n_p))
    w_ht = jnp.concatenate([w_h, w_t], axis=-1)                  # (F, 2Np)

    r_h = pad_to(params["R_H"], (rec_depth, n_p, n_p))
    r_t = pad_to(params["R_T"], (rec_depth, n_p, n_p))
    r_fused = jnp.concatenate([r_h, r_t], axis=-1)               # (D, Np, 2Np)

    b_h = pad_to(params["b_H"], (rec_depth, 1, n_p))
    b_t = pad_to(params["b_T"], (rec_depth, 1, n_p))
    b_fused = jnp.concatenate([b_h, b_t], axis=-1)               # (D, 1, 2Np)

    # ---- hoisted input projections: one big GEMM over the whole sequence ----
    wx = jnp.einsum("bsf,fg->bsg", x.astype(f32), w_ht)          # (B, S, 2Np)
    wx = jnp.pad(wx, ((0, b_p - batch), (0, seq_p - seq), (0, 0)))
    wx_km = jnp.transpose(wx, (1, 0, 2))                         # (Sp, Bp, 2Np)

    kernel = functools.partial(_rhn_kernel, rec_depth=rec_depth,
                               t_block=t_block, n_units_p=n_p)

    n_bb = b_p // batch_block
    n_tb = seq_p // t_block

    preds_km, hw_km = pl.pallas_call(
        kernel,
        out_shape=(
            jax.ShapeDtypeStruct((seq_p, b_p, n_p), f32),
            jax.ShapeDtypeStruct((seq_p, rec_depth, b_p, n_p), f32),
        ),
        grid_spec=pltpu.PrefetchScalarGridSpec(
            num_scalar_prefetch=0,
            grid=(n_bb, n_tb),
            in_specs=[
                # precomputed input projections, tiled over (time, batch)
                pl.BlockSpec((t_block, batch_block, 2 * n_p),
                             lambda b, t: (t, b, 0)),
                # fused recurrent weights / biases: loop-invariant, whole array
                pl.BlockSpec((rec_depth, n_p, 2 * n_p), lambda b, t: (0, 0, 0)),
                pl.BlockSpec((rec_depth, 1, 2 * n_p), lambda b, t: (0, 0, 0)),
            ],
            out_specs=[
                pl.BlockSpec((t_block, batch_block, n_p),
                             lambda b, t: (t, b, 0)),
                pl.BlockSpec((t_block, rec_depth, batch_block, n_p),
                             lambda b, t: (t, 0, b, 0)),
            ],
            scratch_shapes=[pltpu.VMEM((batch_block, n_p), f32)],
        ),
        compiler_params=pltpu.CompilerParams(
            # batch blocks are independent (megacore-parallel); time is serial.
            dimension_semantics=("parallel", "arbitrary"),
            vmem_limit_bytes=32 * 1024 * 1024,
        ),
    )(wx_km, r_fused, b_fused)

    # Slice off padding and restore the module's output layouts.
    preds = preds_km[:seq, :batch, :n_units]          # (S, B, N)
    hw = hw_km[:seq, :, :batch, :n_units]             # (S, D, B, N)
    out = jnp.transpose(preds, (1, 0, 2))             # (B, S, N)
    highway = jnp.transpose(hw, (2, 0, 3, 1))         # (B, S, N, D)
    return out, highway


def rhn_reference(x, params, *, n_units, rec_depth):
    """Pure-JAX reference matching the PyTorch forward."""
    batch, seq, _ = x.shape
    wh, wt, rh, rt, bh, bt = (params["W_H"], params["W_T"], params["R_H"],
                              params["R_T"], params["b_H"], params["b_T"])
    s = jnp.zeros((batch, n_units), jnp.float32)
    preds, hws = [], []
    for t in range(seq):
        x_t = x[:, t, :]
        all_s = []
        for l in range(rec_depth):
            pre_h = s @ rh[l] + bh[l]
            pre_t = s @ rt[l] + bt[l]
            if l == 0:
                pre_h = pre_h + x_t @ wh
                pre_t = pre_t + x_t @ wt
            h_l = jnp.tanh(pre_h)
            t_l = jax.nn.sigmoid(pre_t)
            s = h_l * t_l + (1.0 - t_l) * s
            all_s.append(s)
        preds.append(s)
        hws.append(jnp.stack(all_s))                    # (D, B, N)
    preds = jnp.stack(preds)                            # (S, B, N)
    hws = jnp.stack(hws)                                # (S, D, B, N)
    return jnp.transpose(preds, (1, 0, 2)), jnp.transpose(hws, (2, 0, 3, 1))


def init_params(key, in_feats, n_units, rec_depth):
    """Deterministic init (PyTorch Linear stores W as (out,in); we store (in,out))."""
    ks = jax.random.split(key, 6)
    u = lambda k, shape, fan_in: jax.random.uniform(
        k, shape, jnp.float32, -1.0 / jnp.sqrt(fan_in), 1.0 / jnp.sqrt(fan_in))
    return {
        "W_H": u(ks[0], (in_feats, n_units), in_feats),
        "W_T": u(ks[1], (in_feats, n_units), in_feats),
        "R_H": u(ks[2], (rec_depth, n_units, n_units), n_units),
        "R_T": u(ks[3], (rec_depth, n_units, n_units), n_units),
        "b_H": u(ks[4], (rec_depth, 1, n_units), n_units),
        "b_T": u(ks[5], (rec_depth, 1, n_units), n_units),
    }


if __name__ == "__main__":
    batch, seq, in_feats = 2, 8, 4
    n_units, rec_depth = 32, 3

    key = jax.random.PRNGKey(0)
    k_x, k_p = jax.random.split(key)
    x = jax.random.normal(k_x, (batch, seq, in_feats), jnp.float32)
    params = init_params(k_p, in_feats, n_units, rec_depth)

    out, highway = rhn_forward(x, params, n_units=n_units, rec_depth=rec_depth)
    out = jax.block_until_ready(out)
    highway = jax.block_until_ready(highway)

    out_ref, hw_ref = rhn_reference(x, params, n_units=n_units, rec_depth=rec_depth)
    assert out.shape == (batch, seq, n_units)
    assert highway.shape == (batch, seq, n_units, rec_depth)
    assert jnp.allclose(out, out_ref, atol=3e-5), "preds mismatch"
    assert jnp.allclose(highway, hw_ref, atol=3e-5), "highway_states mismatch"

    print("KERNEL_OK")
</pallas_src>

<mosaic_0001>
module attributes {stable_mosaic.version = 11 : i64} {
  func.func @_rhn_kernel(%arg0: i32, %arg1: i32, %arg2: memref<8x8x256xf32, #tpu.memory_space<vmem>>, %arg3: memref<3x128x256xf32, #tpu.memory_space<vmem>>, %arg4: memref<3x1x256xf32, #tpu.memory_space<vmem>>, %arg5: memref<8x8x128xf32, #tpu.memory_space<vmem>>, %arg6: memref<8x3x8x128xf32, #tpu.memory_space<vmem>>, %arg7: memref<8x128xf32, #tpu.memory_space<vmem>>) attributes {dimension_semantics = [#tpu.dimension_semantics<parallel>, #tpu.dimension_semantics<arbitrary>], iteration_bounds = array<i64: 1, 1>, scalar_prefetch = 0 : i64, scratch_operands = 1 : i64, tpu.core_type = #tpu.core_type<tc>, window_params = [{transform_indices = @transform_0, window_bounds = array<i64: 8, 8, 256>}, {pipeline_mode = #tpu.pipeline_mode<synchronous>, transform_indices = @transform_1, window_bounds = array<i64: 3, 128, 256>}, {pipeline_mode = #tpu.pipeline_mode<synchronous>, transform_indices = @transform_2, window_bounds = array<i64: 3, 1, 256>}, {transform_indices = @transform_3, window_bounds = array<i64: 8, 8, 128>}, {transform_indices = @transform_4, window_bounds = array<i64: 8, 3, 8, 128>}]} {
    %c0_i32 = arith.constant 0 : i32
    %0 = arith.cmpi eq, %arg1, %c0_i32 : i32
    %1 = arith.extui %0 : i1 to i32
    %c0_i32_0 = arith.constant 0 : i32
    %2 = arith.cmpi ne, %1, %c0_i32_0 : i32
    scf.if %2 {
      %cst = arith.constant 0.000000e+00 : f32
      %7 = vector.broadcast %cst : f32 to vector<8x128xf32>
      %c0_6 = arith.constant 0 : index
      %c0_7 = arith.constant 0 : index
      %8 = vector.load %arg7[%c0_6, %c0_7] : memref<8x128xf32, #tpu.memory_space<vmem>>, vector<8x128xf32>
      tpu.vector_store %arg7[%c0_6, %c0_7], %7 {strides = array<i32>} : memref<8x128xf32, #tpu.memory_space<vmem>>, vector<8x128xf32>,
    } else {
    }
    %c0 = arith.constant 0 : index
    %c0_1 = arith.constant 0 : index
    %3 = vector.load %arg7[%c0, %c0_1] : memref<8x128xf32, #tpu.memory_space<vmem>>, vector<8x128xf32>
    %c0_i32_2 = arith.constant 0 : i32
    %c8_i32 = arith.constant 8 : i32
    %4 = arith.addi %c0_i32_2, %c8_i32 : i32
    %c1_i32 = arith.constant 1 : i32
    %5 = scf.for %arg8 = %c0_i32_2 to %4 step %c1_i32 iter_args(%arg9 = %3) -> (vector<8x128xf32>)  : i32 {
      %7 = arith.index_cast %arg8 : i32 to index
      %c0_6 = arith.constant 0 : index
      %c0_7 = arith.constant 0 : index
      %8 = vector.load %arg2[%7, %c0_6, %c0_7] : memref<8x8x256xf32, #tpu.memory_space<vmem>>, vector<1x8x256xf32>
      %9 = vector.shape_cast %8 : vector<1x8x256xf32> to vector<8x256xf32>
      %c0_8 = arith.constant 0 : index
      %c0_9 = arith.constant 0 : index
      %c0_10 = arith.constant 0 : index
      %10 = vector.load %arg3[%c0_8, %c0_9, %c0_10] : memref<3x128x256xf32, #tpu.memory_space<vmem>>, vector<1x128x256xf32>
      %11 = vector.shape_cast %10 : vector<1x128x256xf32> to vector<128x256xf32>
      %cst = arith.constant dense<0.000000e+00> : vector<8x256xf32>
      %12 = tpu.matmul %arg9, %11, %cst {dimension_numbers = #tpu.dot_dimension_numbers<[1], [0], [0], [1], [0, 0, 1, 1], [], []>} : vector<8x128xf32>, vector<128x256xf32>, vector<8x256xf32> -> vector<8x256xf32>
      %c0_11 = arith.constant 0 : index
      %c0_12 = arith.constant 0 : index
      %c0_13 = arith.constant 0 : index
      %13 = vector.load %arg4[%c0_11, %c0_12, %c0_13] : memref<3x1x256xf32, #tpu.memory_space<vmem>>, vector<1x1x256xf32>
      %14 = vector.shape_cast %13 : vector<1x1x256xf32> to vector<1x256xf32>
      %15 = vector.broadcast %14 : vector<1x256xf32> to vector<8x256xf32>
      %16 = arith.addf %12, %15 : vector<8x256xf32>
      %17 = arith.addf %16, %9 : vector<8x256xf32>
      %18 = vector.extract_strided_slice %17 {offsets = [0, 0], sizes = [8, 128], strides = [1, 1]} : vector<8x256xf32> to vector<8x128xf32>
      %19 = math.tanh %18 : vector<8x128xf32>
      %20 = vector.extract_strided_slice %17 {offsets = [0, 128], sizes = [8, 128], strides = [1, 1]} : vector<8x256xf32> to vector<8x128xf32>
      %21 = arith.negf %20 : vector<8x128xf32>
      %22 = math.exp %21 : vector<8x128xf32>
      %cst_14 = arith.constant 1.000000e+00 : f32
      %23 = vector.broadcast %cst_14 : f32 to vector<8x128xf32>
      %24 = arith.addf %23, %22 : vector<8x128xf32>
      %25 = arith.divf %23, %24 : vector<8x128xf32>
      %26 = arith.mulf %19, %25 : vector<8x128xf32>
      %cst_15 = arith.constant 1.000000e+00 : f32
      %27 = vector.broadcast %cst_15 : f32 to vector<8x128xf32>
      %28 = arith.subf %27, %25 : vector<8x128xf32>
      %29 = arith.mulf %28, %arg9 : vector<8x128xf32>
      %30 = arith.addf %26, %29 : vector<8x128xf32>
      %31 = arith.index_cast %arg8 : i32 to index
      %c0_16 = arith.constant 0 : index
      %c0_17 = arith.constant 0 : index
      %c0_18 = arith.constant 0 : index
      %32 = vector.load %arg6[%31, %c0_16, %c0_17, %c0_18] : memref<8x3x8x128xf32, #tpu.memory_space<vmem>>, vector<1x1x8x128xf32>
      %33 = vector.shape_cast %32 : vector<1x1x8x128xf32> to vector<8x128xf32>
      %34 = vector.shape_cast %30 : vector<8x128xf32> to vector<1x1x8x128xf32>
      tpu.vector_store %arg6[%31, %c0_16, %c0_17, %c0_18], %34 {strides = array<i32>} : memref<8x3x8x128xf32, #tpu.memory_space<vmem>>, vector<1x1x8x128xf32>,
      %c1 = arith.constant 1 : index
      %c0_19 = arith.constant 0 : index
      %c0_20 = arith.constant 0 : index
      %35 = vector.load %arg3[%c1, %c0_19, %c0_20] : memref<3x128x256xf32, #tpu.memory_space<vmem>>, vector<1x128x256xf32>
      %36 = vector.shape_cast %35 : vector<1x128x256xf32> to vector<128x256xf32>
      %cst_21 = arith.constant dense<0.000000e+00> : vector<8x256xf32>
      %37 = tpu.matmul %30, %36, %cst_21 {dimension_numbers = #tpu.dot_dimension_numbers<[1], [0], [0], [1], [0, 0, 1, 1], [], []>} : vector<8x128xf32>, vector<128x256xf32>, vector<8x256xf32> -> vector<8x256xf32>
      %c1_22 = arith.constant 1 : index
      %c0_23 = arith.constant 0 : index
      %c0_24 = arith.constant 0 : index
      %38 = vector.load %arg4[%c1_22, %c0_23, %c0_24] : memref<3x1x256xf32, #tpu.memory_space<vmem>>, vector<1x1x256xf32>
      %39 = vector.shape_cast %38 : vector<1x1x256xf32> to vector<1x256xf32>
      %40 = vector.broadcast %39 : vector<1x256xf32> to vector<8x256xf32>
      %41 = arith.addf %37, %40 : vector<8x256xf32>
      %42 = vector.extract_strided_slice %41 {offsets = [0, 0], sizes = [8, 128], strides = [1, 1]} : vector<8x256xf32> to vector<8x128xf32>
      %43 = math.tanh %42 : vector<8x128xf32>
      %44 = vector.extract_strided_slice %41 {offsets = [0, 128], sizes = [8, 128], strides = [1, 1]} : vector<8x256xf32> to vector<8x128xf32>
      %45 = arith.negf %44 : vector<8x128xf32>
      %46 = math.exp %45 : vector<8x128xf32>
      %cst_25 = arith.constant 1.000000e+00 : f32
      %47 = vector.broadcast %cst_25 : f32 to vector<8x128xf32>
      %48 = arith.addf %47, %46 : vector<8x128xf32>
      %49 = arith.divf %47, %48 : vector<8x128xf32>
      %50 = arith.mulf %43, %49 : vector<8x128xf32>
      %cst_26 = arith.constant 1.000000e+00 : f32
      %51 = vector.broadcast %cst_26 : f32 to vector<8x128xf32>
      %52 = arith.subf %51, %49 : vector<8x128xf32>
      %53 = arith.mulf %52, %30 : vector<8x128xf32>
      %54 = arith.addf %50, %53 : vector<8x128xf32>
      %55 = arith.index_cast %arg8 : i32 to index
      %c1_27 = arith.constant 1 : index
      %c0_28 = arith.constant 0 : index
      %c0_29 = arith.constant 0 : index
      %56 = vector.load %arg6[%55, %c1_27, %c0_28, %c0_29] : memref<8x3x8x128xf32, #tpu.memory_space<vmem>>, vector<1x1x8x128xf32>
      %57 = vector.shape_cast %56 : vector<1x1x8x128xf32> to vector<8x128xf32>
      %58 = vector.shape_cast %54 : vector<8x128xf32> to vector<1x1x8x128xf32>
      tpu.vector_store %arg6[%55, %c1_27, %c0_28, %c0_29], %58 {strides = array<i32>} : memref<8x3x8x128xf32, #tpu.memory_space<vmem>>, vector<1x1x8x128xf32>,
      %c2 = arith.constant 2 : index
      %c0_30 = arith.constant 0 : index
      %c0_31 = arith.constant 0 : index
      %59 = vector.load %arg3[%c2, %c0_30, %c0_31] : memref<3x128x256xf32, #tpu.memory_space<vmem>>, vector<1x128x256xf32>
      %60 = vector.shape_cast %59 : vector<1x128x256xf32> to vector<128x256xf32>
      %cst_32 = arith.constant dense<0.000000e+00> : vector<8x256xf32>
      %61 = tpu.matmul %54, %60, %cst_32 {dimension_numbers = #tpu.dot_dimension_numbers<[1], [0], [0], [1], [0, 0, 1, 1], [], []>} : vector<8x128xf32>, vector<128x256xf32>, vector<8x256xf32> -> vector<8x256xf32>
      %c2_33 = arith.constant 2 : index
      %c0_34 = arith.constant 0 : index
      %c0_35 = arith.constant 0 : index
      %62 = vector.load %arg4[%c2_33, %c0_34, %c0_35] : memref<3x1x256xf32, #tpu.memory_space<vmem>>, vector<1x1x256xf32>
      %63 = vector.shape_cast %62 : vector<1x1x256xf32> to vector<1x256xf32>
      %64 = vector.broadcast %63 : vector<1x256xf32> to vector<8x256xf32>
      %65 = arith.addf %61, %64 : vector<8x256xf32>
      %66 = vector.extract_strided_slice %65 {offsets = [0, 0], sizes = [8, 128], strides = [1, 1]} : vector<8x256xf32> to vector<8x128xf32>
      %67 = math.tanh %66 : vector<8x128xf32>
      %68 = vector.extract_strided_slice %65 {offsets = [0, 128], sizes = [8, 128], strides = [1, 1]} : vector<8x256xf32> to vector<8x128xf32>
      %69 = arith.negf %68 : vector<8x128xf32>
      %70 = math.exp %69 : vector<8x128xf32>
      %cst_36 = arith.constant 1.000000e+00 : f32
      %71 = vector.broadcast %cst_36 : f32 to vector<8x128xf32>
      %72 = arith.addf %71, %70 : vector<8x128xf32>
      %73 = arith.divf %71, %72 : vector<8x128xf32>
      %74 = arith.mulf %67, %73 : vector<8x128xf32>
      %cst_37 = arith.constant 1.000000e+00 : f32
      %75 = vector.broadcast %cst_37 : f32 to vector<8x128xf32>
      %76 = arith.subf %75, %73 : vector<8x128xf32>
      %77 = arith.mulf %76, %54 : vector<8x128xf32>
      %78 = arith.addf %74, %77 : vector<8x128xf32>
      %79 = arith.index_cast %arg8 : i32 to index
      %c2_38 = arith.constant 2 : index
      %c0_39 = arith.constant 0 : index
      %c0_40 = arith.constant 0 : index
      %80 = vector.load %arg6[%79, %c2_38, %c0_39, %c0_40] : memref<8x3x8x128xf32, #tpu.memory_space<vmem>>, vector<1x1x8x128xf32>
      %81 = vector.shape_cast %80 : vector<1x1x8x128xf32> to vector<8x128xf32>
      %82 = vector.shape_cast %78 : vector<8x128xf32> to vector<1x1x8x128xf32>
      tpu.vector_store %arg6[%79, %c2_38, %c0_39, %c0_40], %82 {strides = array<i32>} : memref<8x3x8x128xf32, #tpu.memory_space<vmem>>, vector<1x1x8x128xf32>,
      %83 = arith.index_cast %arg8 : i32 to index
      %c0_41 = arith.constant 0 : index
      %c0_42 = arith.constant 0 : index
      %84 = vector.load %arg5[%83, %c0_41, %c0_42] : memref<8x8x128xf32, #tpu.memory_space<vmem>>, vector<1x8x128xf32>
      %85 = vector.shape_cast %84 : vector<1x8x128xf32> to vector<8x128xf32>
      %86 = vector.shape_cast %78 : vector<8x128xf32> to vector<1x8x128xf32>
      tpu.vector_store %arg5[%83, %c0_41, %c0_42], %86 {strides = array<i32>} : memref<8x8x128xf32, #tpu.memory_space<vmem>>, vector<1x8x128xf32>,
      scf.yield %78 : vector<8x128xf32>
    }
    %c8_i32_3 = arith.constant 8 : i32
    %c0_4 = arith.constant 0 : index
    %c0_5 = arith.constant 0 : index
    %6 = vector.load %arg7[%c0_4, %c0_5] : memref<8x128xf32, #tpu.memory_space<vmem>>, vector<8x128xf32>
    tpu.vector_store %arg7[%c0_4, %c0_5], %5 {strides = array<i32>} : memref<8x128xf32, #tpu.memory_space<vmem>>, vector<8x128xf32>,
    return
  }
  func.func @transform_0(%arg0: i32, %arg1: i32) -> (i32, i32, i32) {
    %c0_i32 = arith.constant 0 : i32
    %c0_i32_0 = arith.constant 0 : i32
    return %arg1, %arg0, %c0_i32 : i32, i32, i32
  }
  func.func @transform_1(%arg0: i32, %arg1: i32) -> (i32, i32, i32) {
    %c0_i32 = arith.constant 0 : i32
    %c0_i32_0 = arith.constant 0 : i32
    %c0_i32_1 = arith.constant 0 : i32
    %c0_i32_2 = arith.constant 0 : i32
    return %c0_i32, %c0_i32_0, %c0_i32_1 : i32, i32, i32
  }
  func.func @transform_2(%arg0: i32, %arg1: i32) -> (i32, i32, i32) {
    %c0_i32 = arith.constant 0 : i32
    %c0_i32_0 = arith.constant 0 : i32
    %c0_i32_1 = arith.constant 0 : i32
    %c0_i32_2 = arith.constant 0 : i32
    return %c0_i32, %c0_i32_0, %c0_i32_1 : i32, i32, i32
  }
  func.func @transform_3(%arg0: i32, %arg1: i32) -> (i32, i32, i32) {
    %c0_i32 = arith.constant 0 : i32
    %c0_i32_0 = arith.constant 0 : i32
    return %arg1, %arg0, %c0_i32 : i32, i32, i32
  }
  func.func @transform_4(%arg0: i32, %arg1: i32) -> (i32, i32, i32, i32) {
    %c0_i32 = arith.constant 0 : i32
    %c0_i32_0 = arith.constant 0 : i32
    %c0_i32_1 = arith.constant 0 : i32
    return %arg1, %c0_i32, %arg0, %c0_i32_0 : i32, i32, i32, i32
  }
}

</mosaic_0001>

<bundles_post_ra>
// kernel: tpu_custom_call.1
= control target key start
LH: loop header
LB: loop body
LE: loop exit
PB: predicated region body
PF: predicated region fallthrough
CT: control target
= control target key end

     0   :  { %10 = vsyncpa [#allocation4], 0  ;;  %s909_s0 = inlined_call_operand.hbm [shape: f32[8,8,256], index: 0, kind: input, shape index: {}]   ;;  %s910_s1 = inlined_call_operand.hbm [shape: f32[3,128,256], index: 1, kind: input, shape index: {}]   ;;  %s911_s2 = inlined_call_operand.vmem [shape: f32[3,1,256], index: 2, kind: input, shape index: {}]   ;;  %s912_s3 = inlined_call_operand.hbm [shape: f32[8,8,128], index: 3, kind: output, shape index: {0}]   ;;  %s913_s4 = inlined_call_operand.hbm [shape: f32[8,3,8,128], index: 4, kind: output, shape index: {1}]  }
   0x1   :  { %11 = vsyncpa [#allocation7], 0 }
   0x2   :  { %12 = vsyncpa [#allocation5], 0 }
   0x3   :  { %13 = vsyncpa [#allocation10], 0  ;;  %s778_s15 = smov [#allocation3]   ;;  %s666_s19 = scalar_lea.hbm %s909_s0, 2048 }
   0x4   :  { %s19_s16 = sshll.u32 %s778_s15, 4  ;;  %p667_p0 = scmp.ne.s32.totalorder %s909_s0, %s666_s19  ;;  %s20_s16 = int_to_ptr.vmem [resolvable:$true] %s19_s16 }
   0x5   :  { %p670_p1 = scmp.lt.u32.totalorder %s666_s19, %s909_s0 }
   0x7   :  { %p672_p2 = pnand %p670_p1, %p667_p0 }
   0x9   :  { %675 = shalt.err (!%p672_p2)
}
   0xa   :  { %s676_s24 = scalar_lea.vmem %s20_s16, 2048  ;;  %p681_p4 = scmp.lt.s32.totalorder %s20_s16, %s20_s16 }
   0xb   :  { %p677_p3 = scmp.ne.s32.totalorder %s20_s16, %s676_s24  ;;  %p682_p5 = scmp.lt.s32.totalorder %s676_s24, %s676_s24 }
   0xd   :  { %p683_p6 = por %p682_p5, %p681_p4 }
   0xf   :  { %p684_p7 = pnand %p683_p6, %p677_p3 }
  0x11   :  { %687 = shalt.err (!%p684_p7)
}
  0x12   :  { %s779_s25 = smov 256   ;;  %s780_s26 = smov 16  }
  0x13   :  { %25 = dma.hbm_to_vmem [thread:$0]  %s909_s0, 2048, %s20_s16, [#allocation4], %s779_s25, %s779_s25, %s780_s26  }
  0x14   :  { %s781_s29 = smov [#allocation6]   ;;  %s688_s7 = scalar_lea.hbm %s910_s1, 12288 }
  0x15   :  { %s31_s30 = sshll.u32 %s781_s29, 4  ;;  %p689_p8 = scmp.ne.s32.totalorder %s910_s1, %s688_s7  ;;  %s32_s30 = int_to_ptr.vmem [resolvable:$true] %s31_s30 }
  0x16   :  { %p692_p9 = scmp.lt.u32.totalorder %s688_s7, %s910_s1 }
  0x18   :  { %p694_p10 = pnand %p692_p9, %p689_p8 }
  0x1a   :  { %697 = shalt.err (!%p694_p10)
}
  0x1b   :  { %s698_s12 = scalar_lea.vmem %s32_s30, 12288  ;;  %p703_p12 = scmp.lt.s32.totalorder %s32_s30, %s32_s30 }
  0x1c   :  { %p699_p11 = scmp.ne.s32.totalorder %s32_s30, %s698_s12  ;;  %p704_p13 = scmp.lt.s32.totalorder %s698_s12, %s698_s12 }
  0x1e   :  { %p705_p0 = por %p704_p13, %p703_p12 }
  0x20   :  { %p706_p1 = pnand %p705_p0, %p699_p11 }
  0x22   :  { %709 = shalt.err (!%p706_p1)
}
  0x23   :  { %37 = dma.hbm_to_vmem [thread:$0]  %s910_s1, 12288, %s32_s30, [#allocation7], %s779_s25, %s779_s25, %s780_s26  }
  0x24   :  { %762 = dma.done.wait [#allocation4], 2048  }
  0x25   :  { %763 = vsyncadd [#allocation4], 4294965248 }
  0x26   :  { %764 = dma.done.wait [#allocation7], 12288  }
  0x27   :  { %765 = vsyncadd [#allocation7], 4294955008  ;;  %v836_v0 = vmov 0.0   ;;  %s838_s14 = smov 0  }
  0x28 LB: > { %v65_v1 = vld [vmem:[#allocation6 + $0x8] sm:$0xff]  ;;  %v67_v2 = vld [vmem:[#allocation6 + $0x18] sm:$0xff]  ;;  %v64_v3 = vld [vmem:[#allocation6] sm:$0xff]  ;;  %v782_v8 = vmov 0.0   ;;  %s525_s1 = sshll.u32 %s776_s14, 4  ;;  %s192_s18 = smul.u32 24, %s776_s14  ;;  %s776_s14 = sphi %s838_s14, %s57_s14   ;;  %v772_v0 = vphi %v836_v0, %v453_v0  }
  0x29   : > { %v526_v4 = vpack.c.bf16 %v67_v2, %v65_v1  ;;  %v66_v5 = vld [vmem:[#allocation6 + $0x10] sm:$0xff]  ;;  %v69_v6 = vld [vmem:[#allocation6 + $0x28] sm:$0xff]  ;;  %v71_v7 = vld [vmem:[#allocation6 + $0x38] sm:$0xff]  ;;  %172 = vmatprep.mubr.f32.mxu0 %v782_v8  ;;  %305 = vmatprep.mubr.f32.mxu1 %v782_v8  ;;  %s61_s17 = scalar_lea.vmem [#allocation3], %s525_s1  ;;  %s524_s24 = sshll.u32 %s776_s14, 3 }
  0x2a   : > { %v528_v9 = vpack.c.bf16 %v66_v5, %v64_v3  ;;  %v530_v10 = vpack.c.bf16 %v71_v7, %v69_v6  ;;  %v68_v11 = vld [vmem:[#allocation6 + $0x20] sm:$0xff]  ;;  %v70_v12 = vld [vmem:[#allocation6 + $0x30] sm:$0xff]  ;;  %v73_v13 = vld [vmem:[#allocation6 + $0x48] sm:$0xff]  ;;  %s861_s19 = scalar_lea.vmem [#allocation9], %s192_s18  ;;  %s458_s25 = scalar_lea.vmem [#allocation8], %s524_s24 }
  0x2b   : > { %527 = vmatprep.subr.bf16.mxu0 %v526_v4  ;;  %v75_v14 = vld [vmem:[#allocation6 + $0x58] sm:$0xff]  ;;  %v532_v15 = vpack.c.bf16 %v70_v12, %v68_v11  ;;  %v72_v17 = vld [vmem:[#allocation6 + $0x40] sm:$0xff]  ;;  %v74_v18 = vld [vmem:[#allocation6 + $0x50] sm:$0xff]  ;;  %s57_s14 = sadd.s32 1, %s776_s14  }
  0x2c   : > { %529 = vmatpush1.bf16.msra.mxu0 %v528_v9  ;;  %v534_v16 = vpack.c.bf16 %v75_v14, %v73_v13  ;;  %v77_v19 = vld [vmem:[#allocation6 + $0x68] sm:$0xff]  ;;  %v79_v20 = vld [vmem:[#allocation6 + $0x78] sm:$0xff]  ;;  %v536_v21 = vpack.c.bf16 %v74_v18, %v72_v17  ;;  %v76_v23 = vld [vmem:[#allocation6 + $0x60] sm:$0xff]  ;;  %p54_p2 = scmp.ge.s32.totalorder %s57_s14, 8  }
  0x2d   : > { %531 = vmatprep.subr.bf16.mxu0 %v530_v10  ;;  %v538_v22 = vpack.c.bf16 %v79_v20, %v77_v19  ;;  %v78_v24 = vld [vmem:[#allocation6 + $0x70] sm:$0xff]  ;;  %v81_v25 = vld [vmem:[#allocation6 + $0x88] sm:$0xff]  ;;  %v83_v26 = vld [vmem:[#allocation6 + $0x98] sm:$0xff]  ;;  %s783_s26 = smov (%p54_p2), [#allocation8]  }
  0x2e   : > { %v540_v27 = vpack.c.bf16 %v78_v24, %v76_v23  ;;  %v542_v28 = vpack.c.bf16 %v83_v26, %v81_v25  ;;  %v80_v29 = vld [vmem:[#allocation6 + $0x80] sm:$0xff]  ;;  %v82_v30 = vld [vmem:[#allocation6 + $0x90] sm:$0xff]  ;;  %v85_v31 = vld [vmem:[#allocation6 + $0xa8] sm:$0xff]  ;;  %s466_s27 = sshll.u32 (%p54_p2), %s783_s26, 4  ;;  %s467_s27 = int_to_ptr.vmem [resolvable:$true] %s466_s27 }
  0x2f   : > { %v87_v32 = vld [vmem:[#allocation6 + $0xb8] sm:$0xff]  ;;  %v544_v33 = vpack.c.bf16 %v82_v30, %v80_v29  ;;  %v84_v35 = vld [vmem:[#allocation6 + $0xa0] sm:$0xff]  ;;  %v86_v36 = vld [vmem:[#allocation6 + $0xb0] sm:$0xff]  ;;  %s710_s28 = scalar_lea.vmem (%p54_p2), %s467_s27, 1024  ;;  %p715_p4 = scmp.lt.s32.totalorder (%p54_p2), %s467_s27, %s467_s27 }
  0x30   : > { %533 = vmatpush1.bf16.msra.mxu0 %v532_v15  ;;  %v546_v34 = vpack.c.bf16 %v87_v32, %v85_v31  ;;  %v89_v37 = vld [vmem:[#allocation6 + $0xc8] sm:$0xff]  ;;  %v91_v38 = vld [vmem:[#allocation6 + $0xd8] sm:$0xff]  ;;  %v548_v39 = vpack.c.bf16 %v86_v36, %v84_v35  ;;  %v88_v41 = vld [vmem:[#allocation6 + $0xc0] sm:$0xff]  ;;  %v98_v35 = vlaneseq  ;;  %p711_p3 = scmp.ne.s32.totalorder (%p54_p2), %s467_s27, %s710_s28  ;;  %p716_p5 = scmp.lt.s32.totalorder (%p54_p2), %s710_s28, %s710_s28 }
  0x31   : > { %535 = vmatprep.subr.bf16.mxu0 %v534_v16  ;;  %v550_v40 = vpack.c.bf16 %v91_v38, %v89_v37  ;;  %v90_v42 = vld [vmem:[#allocation6 + $0xd0] sm:$0xff]  ;;  %v93_v43 = vld [vmem:[#allocation6 + $0xe8] sm:$0xff]  ;;  %v95_v44 = vld [vmem:[#allocation6 + $0xf8] sm:$0xff] }
  0x32   : > { %v552_v45 = vpack.c.bf16 %v90_v42, %v88_v41  ;;  %v554_v46 = vpack.c.bf16 %v95_v44, %v93_v43  ;;  %v92_v47 = vld [vmem:[#allocation6 + $0xe0] sm:$0xff]  ;;  %v94_v48 = vld [vmem:[#allocation6 + $0xf0] sm:$0xff]  ;;  %v197_v50 = vld [vmem:[#allocation6 + $0x108] sm:$0xff]  ;;  %v99_v36 = vshrl.u32 %v98_v35, 7  ;;  %p717_p6 = por (%p54_p2), %p716_p5, %p715_p4 }
  0x33   : > { %v556_v49 = vpack.c.bf16 %v94_v48, %v92_v47  ;;  %v199_v51 = vld [vmem:[#allocation6 + $0x118] sm:$0xff]  ;;  %v196_v53 = vld [vmem:[#allocation6 + $0x100] sm:$0xff]  ;;  %v198_v54 = vld [vmem:[#allocation6 + $0x110] sm:$0xff] }
  0x34   : > { %537 = vmatpush1.bf16.msra.mxu0 %v536_v21  ;;  %v558_v52 = vpack.c.bf16 %v199_v51, %v197_v50  ;;  %v560_v55 = vpack.c.bf16 %v198_v54, %v196_v53  ;;  %v201_v56 = vld [vmem:[#allocation6 + $0x128] sm:$0xff]  ;;  %v203_v57 = vld [vmem:[#allocation6 + $0x138] sm:$0xff]  ;;  %v200_v59 = vld [vmem:[#allocation6 + $0x120] sm:$0xff]  ;;  %v847_v37 = vsub.s32 1, %v99_v36  ;;  %v854_v44 = vsub.s32 0, %v99_v36  ;;  %p718_p7 = pnand (%p54_p2), %p717_p6, %p711_p3 }
  0x35   : > { %539 = vmatprep.subr.bf16.mxu0 %v538_v22  ;;  %v562_v58 = vpack.c.bf16 %v203_v57, %v201_v56  ;;  %v202_v60 = vld [vmem:[#allocation6 + $0x130] sm:$0xff]  ;;  %v205_v62 = vld [vmem:[#allocation6 + $0x148] sm:$0xff]  ;;  %v207_v63 = vld [vmem:[#allocation6 + $0x158] sm:$0xff] }
  0x36   : > { %559 = vmatprep.subr.bf16.mxu1 %v558_v52  ;;  %v564_v61 = vpack.c.bf16 %v202_v60, %v200_v59  ;;  %v566_v1 = vpack.c.bf16 %v207_v63, %v205_v62  ;;  %v204_v2 = vld [vmem:[#allocation6 + $0x140] sm:$0xff]  ;;  %v206_v3 = vld [vmem:[#allocation6 + $0x150] sm:$0xff]  ;;  %v209_v5 = vld [vmem:[#allocation6 + $0x168] sm:$0xff] }
  0x37   : > { %561 = vmatpush1.bf16.msra.mxu1 %v560_v55  ;;  %v568_v4 = vpack.c.bf16 %v206_v3, %v204_v2  ;;  %v211_v6 = vld [vmem:[#allocation6 + $0x178] sm:$0xff]  ;;  %v210_v9 = vld [vmem:[#allocation6 + $0x170] sm:$0xff]  ;;  %v213_v11 = vld [vmem:[#allocation6 + $0x188] sm:$0xff] }
  0x38   : > { %541 = vmatpush1.bf16.msra.mxu0 %v540_v27  ;;  %563 = vmatprep.subr.bf16.mxu1 %v562_v58  ;;  %v570_v7 = vpack.c.bf16 %v211_v6, %v209_v5  ;;  %v215_v12 = vld [vmem:[#allocation6 + $0x198] sm:$0xff]  ;;  %v212_v14 = vld [vmem:[#allocation6 + $0x180] sm:$0xff]  ;;  %v214_v15 = vld [vmem:[#allocation6 + $0x190] sm:$0xff] }
  0x39   : > { %543 = vmatprep.subr.bf16.mxu0 %v542_v28  ;;  %v574_v13 = vpack.c.bf16 %v215_v12, %v213_v11  ;;  %v576_v16 = vpack.c.bf16 %v214_v15, %v212_v14  ;;  %v217_v17 = vld [vmem:[#allocation6 + $0x1a8] sm:$0xff]  ;;  %v219_v18 = vld [vmem:[#allocation6 + $0x1b8] sm:$0xff]  ;;  %v216_v19 = vld [vmem:[#allocation6 + $0x1a0] sm:$0xff] }
  0x3a   : > { %v578_v20 = vpack.c.bf16 %v219_v18, %v217_v17  ;;  %v218_v21 = vld [vmem:[#allocation6 + $0x1b0] sm:$0xff]  ;;  %v221_v22 = vld [vmem:[#allocation6 + $0x1c8] sm:$0xff]  ;;  %v223_v23 = vld [vmem:[#allocation6 + $0x1d8] sm:$0xff] }
  0x3b   : > { %565 = vmatpush1.bf16.msra.mxu1 %v564_v61  ;;  %v580_v24 = vpack.c.bf16 %v218_v21, %v216_v19  ;;  %v582_v25 = vpack.c.bf16 %v223_v23, %v221_v22  ;;  %v220_v26 = vld [vmem:[#allocation6 + $0x1c0] sm:$0xff]  ;;  %v222_v27 = vld [vmem:[#allocation6 + $0x1d0] sm:$0xff]  ;;  %v225_v28 = vld [vmem:[#allocation6 + $0x1e8] sm:$0xff] }
  0x3c   : > { %545 = vmatpush1.bf16.msra.mxu0 %v544_v33  ;;  %567 = vmatprep.subr.bf16.mxu1 %v566_v1  ;;  %v227_v29 = vld [vmem:[#allocation6 + $0x1f8] sm:$0xff]  ;;  %v584_v30 = vpack.c.bf16 %v222_v27, %v220_v26  ;;  %v224_v32 = vld [vmem:[#allocation6 + $0x1e0] sm:$0xff]  ;;  %v226_v33 = vld [vmem:[#allocation6 + $0x1f0] sm:$0xff] }
  0x3d   : > { %547 = vmatprep.subr.bf16.mxu0 %v546_v34  ;;  %v586_v31 = vpack.c.bf16 %v227_v29, %v225_v28  ;;  %v588_v34 = vpack.c.bf16 %v226_v33, %v224_v32  ;;  %v96_v38 = vld [vmem:[%s911_s2] sm:$0x3]  ;;  %v63_v41 = vld [vmem:[%s61_s17 + $0x8] sm:$0xff]  ;;  %v330_v60 = vld [vmem:[#allocation6 + $0x218] sm:$0xff] }
  0x3e   : > { %v101_v47 = vrot.slane %v96_v38, %v854_v44  ;;  %v328_v59 = vld [vmem:[#allocation6 + $0x208] sm:$0xff]  ;;  %v327_v62 = vld [vmem:[#allocation6 + $0x200] sm:$0xff]  ;;  %v329_v63 = vld [vmem:[#allocation6 + $0x210] sm:$0xff] }
  0x3f   : > { %569 = vmatpush1.bf16.msra.mxu1 %v568_v4  ;;  %v590_v61 = vpack.c.bf16 %v330_v60, %v328_v59  ;;  %v592_v1 = vpack.c.bf16 %v329_v63, %v327_v62  ;;  %v332_v2 = vld [vmem:[#allocation6 + $0x228] sm:$0xff]  ;;  %v334_v3 = vld [vmem:[#allocation6 + $0x238] sm:$0xff]  ;;  %v331_v4 = vld [vmem:[#allocation6 + $0x220] sm:$0xff] }
  0x40   : > { %549 = vmatpush1.bf16.msra.mxu0 %v548_v39  ;;  %571 = vmatprep.subr.bf16.mxu1 %v570_v7  ;;  %v105_v39 = vrot.slane %v96_v38, %v847_v37  ;;  %v333_v5 = vld [vmem:[#allocation6 + $0x230] sm:$0xff]  ;;  %v336_v7 = vld [vmem:[#allocation6 + $0x248] sm:$0xff]  ;;  %v342_v14 = vld [vmem:[#allocation6 + $0x278] sm:$0xff] }
  0x41   : > { %551 = vmatprep.subr.bf16.mxu0 %v550_v40  ;;  %v596_v6 = vpack.c.bf16 %v333_v5, %v331_v4  ;;  %v337_v11 = vld [vmem:[#allocation6 + $0x250] sm:$0xff]  ;;  %v344_v19 = vld [vmem:[#allocation6 + $0x288] sm:$0xff]  ;;  %v343_v22 = vld [vmem:[#allocation6 + $0x280] sm:$0xff] }
  0x42   : > { %v341_v17 = vld [vmem:[#allocation6 + $0x270] sm:$0xff]  ;;  %v350_v26 = vld [vmem:[#allocation6 + $0x2b8] sm:$0xff]  ;;  %v347_v27 = vld [vmem:[#allocation6 + $0x2a0] sm:$0xff] }
  0x43   : > { %v345_v23 = vld [vmem:[#allocation6 + $0x290] sm:$0xff]  ;;  %v356_v36 = vld [vmem:[#allocation6 + $0x2e8] sm:$0xff]  ;;  %v358_v38 = vld [vmem:[#allocation6 + $0x2f8] sm:$0xff] }
  0x44   : > { %553 = vmatpush1.bf16.msra.mxu0 %v552_v45  ;;  %v349_v29 = vld [vmem:[#allocation6 + $0x2b0] sm:$0xff]  ;;  %v521_v62 = vld [vmem:[%s911_s2 + $0x4] sm:$0x3] }
  0x45   : > { %555 = vmatprep.subr.bf16.mxu0 %v554_v46  ;;  %v612_v32 = vpack.c.bf16 %v349_v29, %v347_v27  ;;  %v353_v35 = vld [vmem:[#allocation6 + $0x2d0] sm:$0xff]  ;;  %v369_v63 = vrot.slane %v521_v62, %v847_v37  ;;  %v365_v4 = vrot.slane %v521_v62, %v854_v44 }
  0x48   : > { %557 = vmatpush1.bf16.msra.mxu0 %v556_v49  ;;  %v62_v49 = vld [vmem:[%s61_s17] sm:$0xff] }
  0x49   : > { %591 = vmatprep.subr.bf16.mxu0 %v590_v61 }
  0x4b   : > { %173 = vmatmul.mubr.f32.vlgmr.msra.gmra.mrb[0].mxu0 %v772_v0 }
  0x4c   : > { %436 = vmatprep.mubr.f32.mxu0 %v782_v8  ;;  %v208_v8 = vld [vmem:[#allocation6 + $0x160] sm:$0xff]  ;;  %593 = vmatpush1.bf16.msra.mxu0 %v592_v1 }
  0x4d   : > { %v572_v10 = vpack.c.bf16 %v210_v9, %v208_v8  ;;  %v338_v8 = vld [vmem:[#allocation6 + $0x258] sm:$0xff] }
  0x4e   : > { %v598_v9 = vpack.c.bf16 %v338_v8, %v336_v7 }
  0x4f   : > { %573 = vmatpush1.bf16.msra.mxu1 %v572_v10  ;;  %v335_v10 = vld [vmem:[#allocation6 + $0x240] sm:$0xff] }
  0x50   : > { %575 = vmatprep.subr.bf16.mxu1 %v574_v13  ;;  %v600_v12 = vpack.c.bf16 %v337_v11, %v335_v10  ;;  %v340_v13 = vld [vmem:[#allocation6 + $0x268] sm:$0xff] }
  0x51   : > { %v602_v15 = vpack.c.bf16 %v342_v14, %v340_v13 }
  0x53   : > { %577 = vmatpush1.bf16.msra.mxu1 %v576_v16  ;;  %v339_v16 = vld [vmem:[#allocation6 + $0x260] sm:$0xff] }
  0x54   : > { %579 = vmatprep.subr.bf16.mxu1 %v578_v20  ;;  %v604_v18 = vpack.c.bf16 %v341_v17, %v339_v16  ;;  %v346_v20 = vld [vmem:[#allocation6 + $0x298] sm:$0xff] }
  0x55   : > { %v606_v21 = vpack.c.bf16 %v346_v20, %v344_v19 }
  0x57   : > { %581 = vmatpush1.bf16.msra.mxu1 %v580_v24  ;;  %v608_v24 = vpack.c.bf16 %v345_v23, %v343_v22 }
  0x58   : > { %583 = vmatprep.subr.bf16.mxu1 %v582_v25  ;;  %v348_v25 = vld [vmem:[#allocation6 + $0x2a8] sm:$0xff] }
  0x59   : > { %v610_v28 = vpack.c.bf16 %v350_v26, %v348_v25 }
  0x5b   : > { %585 = vmatpush1.bf16.msra.mxu1 %v584_v30  ;;  %v352_v30 = vld [vmem:[#allocation6 + $0x2c8] sm:$0xff] }
  0x5c   : > { %587 = vmatprep.subr.bf16.mxu1 %v586_v31  ;;  %v354_v31 = vld [vmem:[#allocation6 + $0x2d8] sm:$0xff] }
  0x5d   : > { %v614_v33 = vpack.c.bf16 %v354_v31, %v352_v30 }
  0x5f   : > { %589 = vmatpush1.bf16.msra.mxu1 %v588_v34  ;;  %v351_v34 = vld [vmem:[#allocation6 + $0x2c0] sm:$0xff] }
 0x11e   : > { %v174_v40 = vpop.f32.mrb[0].mxu0 }
 0x11f   : > { %v176_v42 = vpop.f32.mrb[1].mxu0  ;;  %v175_v48 = vadd.f32 %v174_v40, %v101_v47  ;;  %v618_v40 = vpack.c.bf16 %v358_v38, %v356_v36 }
 0x120   : > { %v177_v43 = vadd.f32 %v176_v42, %v105_v39  ;;  %v616_v39 = vpack.c.bf16 %v353_v35, %v351_v34  ;;  %v357_v42 = vld [vmem:[#allocation6 + $0x2f0] sm:$0xff] }
 0x121   : > { %v179_v50 = vadd.f32 %v175_v48, %v62_v49 }
 0x122   : > { %v180_v45 = vadd.f32 %v177_v43, %v63_v41  ;;  %v355_v41 = vld [vmem:[#allocation6 + $0x2e0] sm:$0xff] }
 0x123   : > { %v620_v43 = vpack.c.bf16 %v357_v42, %v355_v41 }
 0x124   : > { %v517_v46 = vmul.f32 -1.442695, %v180_v45  ;;  %v518_v45 = vld [vmem:[%s911_s2 + $0x2] sm:$0x3] }
 0x126   : > { %648 = vpow2.f32 %v517_v46  ;;  %v238_v46 = vrot.slane %v518_v45, %v847_v37 }
 0x127   : > { %650 = vtanh.f32 %v179_v50 }
 0x130   : > { %v649_v51 = vpop.eup %648 }
 0x131   : > { %v185_v52 = vadd.f32 1.0, %v649_v51  ;;  %v651_v53 = vpop.eup %650  ;;  %v234_v51 = vrot.slane %v518_v45, %v854_v44 }
 0x133   : > { %652 = vrcp.f32 %v185_v52 }
 0x13d   : > { %v653_v54 = vpop.eup %652 }
 0x13e   : > { %v188_v55 = vmul.f32 %v653_v54, %v651_v53  ;;  %v189_v56 = vsub.f32 1.0, %v653_v54 }
 0x140   : > { %v190_v57 = vmul.f32 %v772_v0, %v189_v56  ;;  %v594_v0 = vpack.c.bf16 %v334_v3, %v332_v2 }
 0x142   : > { %v859_v58 = vadd.f32 %v190_v57, %v188_v55  ;;  %595 = vmatprep.subr.bf16.mxu0 %v594_v0 }
 0x143   : > { %597 = vmatpush1.bf16.msra.mxu0 %v596_v6 }
 0x144   : > { %194 = vst [vmem:[%s861_s19] sm:$0xff] %v859_v58  ;;  %306 = vmatmul.mubr.f32.vlgmr.msra.gmra.mrb[0].mxu1 %v859_v58  ;;  %599 = vmatprep.subr.bf16.mxu0 %v598_v9 }
 0x147   : > { %601 = vmatpush1.bf16.msra.mxu0 %v600_v12 }
 0x148   : > { %603 = vmatprep.subr.bf16.mxu0 %v602_v15 }
 0x14b   : > { %605 = vmatpush1.bf16.msra.mxu0 %v604_v18 }
 0x14c   : > { %607 = vmatprep.subr.bf16.mxu0 %v606_v21 }
 0x14f   : > { %609 = vmatpush1.bf16.msra.mxu0 %v608_v24 }
 0x150   : > { %611 = vmatprep.subr.bf16.mxu0 %v610_v28 }
 0x153   : > { %613 = vmatpush1.bf16.msra.mxu0 %v612_v32 }
 0x154   : > { %615 = vmatprep.subr.bf16.mxu0 %v614_v33 }
 0x157   : > { %617 = vmatpush1.bf16.msra.mxu0 %v616_v39 }
 0x158   : > { %619 = vmatprep.subr.bf16.mxu0 %v618_v40 }
 0x15b   : > { %621 = vmatpush1.bf16.msra.mxu0 %v620_v43 }
 0x217   : > { %v307_v47 = vpop.f32.mrb[0].mxu1 }
 0x218   : > { %v309_v48 = vpop.f32.mrb[1].mxu1  ;;  %v308_v52 = vadd.f32 %v307_v47, %v234_v51 }
 0x219   : > { %v310_v49 = vadd.f32 %v309_v48, %v238_v46 }
 0x21b   : > { %v519_v50 = vmul.f32 -1.442695, %v310_v49 }
 0x21d   : > { %654 = vpow2.f32 %v519_v50 }
 0x21e   : > { %656 = vtanh.f32 %v308_v52 }
 0x227   : > { %v655_v53 = vpop.eup %654 }
 0x228   : > { %v316_v54 = vadd.f32 1.0, %v655_v53  ;;  %v657_v55 = vpop.eup %656 }
 0x22a   : > { %658 = vrcp.f32 %v316_v54 }
 0x234   : > { %v659_v56 = vpop.eup %658 }
 0x235   : > { %v319_v57 = vmul.f32 %v659_v56, %v657_v55  ;;  %v320_v59 = vsub.f32 1.0, %v659_v56 }
 0x237   : > { %v321_v60 = vmul.f32 %v320_v59, %v859_v58 }
 0x239   : > { %v322_v61 = vadd.f32 %v321_v60, %v319_v57 }
 0x23b   : > { %520 = vst [vmem:[%s861_s19 + $0x8] sm:$0xff] %v322_v61  ;;  %437 = vmatmul.mubr.f32.vlgmr.msra.gmra.mrb[2].mxu0 %v322_v61 }
 0x30e   : > { %v438_v1 = vpop.f32.mrb[2].mxu0 }
 0x30f   : > { %v440_v2 = vpop.f32.mrb[3].mxu0  ;;  %v439_v5 = vadd.f32 %v438_v1, %v365_v4 }
 0x310   : > { %v441_v3 = vadd.f32 %v440_v2, %v369_v63 }
 0x312   : > { %v522_v0 = vmul.f32 -1.442695, %v441_v3 }
 0x314   : > { %660 = vpow2.f32 %v522_v0 }
 0x315   : > { %662 = vtanh.f32 %v439_v5 }
 0x31e   : > { %v661_v58 = vpop.eup %660 }
 0x31f   : > { %v447_v6 = vadd.f32 1.0, %v661_v58  ;;  %v663_v7 = vpop.eup %662 }
 0x321   : > { %664 = vrcp.f32 %v447_v6 }
 0x32b   : > { %v665_v8 = vpop.eup %664 }
 0x32c   : > { %v450_v9 = vmul.f32 %v665_v8, %v663_v7  ;;  %v451_v10 = vsub.f32 1.0, %v665_v8  ;;  %56 = sbr.rel (!%p54_p2) target bundleno = 40 (0x28), region = 68 }
 0x32e   : > { %v452_v11 = vmul.f32 %v451_v10, %v322_v61 }
 0x330   : > { %v453_v0 = vadd.f32 %v452_v11, %v450_v9  }
 0x332   : > { %523 = vst [vmem:[%s861_s19 + $0x10] sm:$0xff] %v453_v0  ;;  %459 = vst [vmem:[%s458_s25] sm:$0xff] %v453_v0 }
 0x333   :  { %721 = shalt.err (!%p718_p7)
}
 0x334   :  { %s722_s5 = scalar_lea.hbm %s912_s3, 1024 }
 0x335   :  { %p723_p8 = scmp.ne.s32.totalorder %s912_s3, %s722_s5  ;;  %p726_p9 = scmp.lt.u32.totalorder %s722_s5, %s912_s3 }
 0x337   :  { %p728_p10 = pnand %p726_p9, %p723_p8 }
 0x339   :  { %731 = shalt.err (!%p728_p10)
}
 0x33a   :  { %s784_s2 = smov 128   ;;  %s785_s10 = smov 8  }
 0x33b   :  { %472 = dma.vmem_to_hbm [thread:$0]  %s467_s27, 1024, %s912_s3, [#allocation5], %s784_s2, %s784_s2, %s785_s10  }
 0x33c   :  { %s786_s0 = smov [#allocation9]  }
 0x33d   :  { %s478_s13 = sshll.u32 %s786_s0, 4  ;;  %s479_s13 = int_to_ptr.vmem [resolvable:$true] %s478_s13 }
 0x33e   :  { %s732_s14 = scalar_lea.vmem %s479_s13, 3072  ;;  %p737_p12 = scmp.lt.s32.totalorder %s479_s13, %s479_s13 }
 0x33f   :  { %p733_p11 = scmp.ne.s32.totalorder %s479_s13, %s732_s14  ;;  %p738_p13 = scmp.lt.s32.totalorder %s732_s14, %s732_s14 }
 0x341   :  { %p739_p0 = por %p738_p13, %p737_p12 }
 0x343   :  { %p740_p1 = pnand %p739_p0, %p733_p11 }
 0x345   :  { %743 = shalt.err (!%p740_p1)
}
 0x346   :  { %s744_s16 = scalar_lea.hbm %s913_s4, 3072 }
 0x347   :  { %p745_p2 = scmp.ne.s32.totalorder %s913_s4, %s744_s16  ;;  %p748_p3 = scmp.lt.u32.totalorder %s744_s16, %s913_s4 }
 0x349   :  { %p750_p4 = pnand %p748_p3, %p745_p2 }
 0x34b   :  { %753 = shalt.err (!%p750_p4)
}
 0x34c   :  { %484 = dma.vmem_to_hbm [thread:$0]  %s479_s13, 3072, %s913_s4, [#allocation10], %s784_s2, %s784_s2, %s785_s10  }
 0x34d   :  { %766 = dma.done.wait [#allocation5], 1024  }
 0x34e   :  { %767 = vsyncadd [#allocation5], 4294966272 }
 0x34f   :  { %768 = dma.done.wait [#allocation10], 3072  }
 0x350   :  { %769 = vsyncadd [#allocation10], 4294964224 }
 0x351   :  { %491 = vsyncpa [#allocation4], 1 }
 0x352   :  { %492 = vsyncpa [#allocation7], 1 }
 0x353   :  { %493 = vsyncpa [#allocation5], 1 }
 0x354   :  { %494 = vsyncpa [#allocation10], 1 }

</bundles_post_ra>
